<compile_context>
chip_gen: v5e
topology: v5e:2x2
jax: 0.10.0
libtpu: 0.0.40
codegen_flags: <defaults>
</compile_context>

<pallas_src>
import math

import jax
import jax.numpy as jnp
from jax import lax
from jax.experimental import pallas as pl
from jax.experimental.pallas import tpu as pltpu


def _round_up(x: int, m: int) -> int:
    return ((x + m - 1) // m) * m


def _vmem_limit_bytes() -> int:
    # ~3/4 of physical VMEM: 96 MiB on v5e/v6e (128 MiB), 48 MiB on v7x (64 MiB).
    try:
        cap = pltpu.get_tpu_info().vmem_capacity_bytes
    except Exception:
        cap = 128 * 1024 * 1024
    return int(min(96 * 1024 * 1024, cap * 3 // 4))


# ------------------------------------------------------------------ linear ---
def _linear_kernel(x_ref, w_ref, b_ref, o_ref):
    # y = x @ w^T + b.  Operands in native dtype, f32 MXU accumulation.
    y = lax.dot_general(x_ref[...], w_ref[...], (((1,), (1,)), ((), ())),
                        preferred_element_type=jnp.float32)
    y = y + b_ref[...].astype(jnp.float32)
    o_ref[...] = y.astype(o_ref.dtype)


def linear(x2d, w, b, *, max_row_tile=256, max_col_tile=512):
    """PyTorch-style Linear: y = x2d @ w.T + b.

    x2d: (N, K); w: (M, K) in PyTorch (out, in) layout, contracted on its last
    dim in-kernel (no wrapper transpose); b: (M,).
    """
    N, K = x2d.shape
    M = w.shape[0]

    tm = _round_up(min(N, max_row_tile), 8)
    n_pad = _round_up(N, tm)
    if M <= max_col_tile:
        tn, m_pad = M, M                       # single full-width column block
    else:
        tn = max_col_tile                      # multiple of 128 (lane aligned)
        m_pad = _round_up(M, tn)

    if n_pad != N:
        x2d = jnp.pad(x2d, ((0, n_pad - N), (0, 0)))
    if m_pad != M:
        w = jnp.pad(w, ((0, m_pad - M), (0, 0)))
        b = jnp.pad(b, ((0, m_pad - M),))
    b2d = b.reshape(1, m_pad)

    out = pl.pallas_call(
        _linear_kernel,
        out_shape=jax.ShapeDtypeStruct((n_pad, m_pad), x2d.dtype),
        grid=(n_pad // tm, m_pad // tn),
        in_specs=[
            pl.BlockSpec((tm, K), lambda i, j: (i, 0)),
            pl.BlockSpec((tn, K), lambda i, j: (j, 0)),
            pl.BlockSpec((1, tn), lambda i, j: (0, j)),
        ],
        out_specs=pl.BlockSpec((tm, tn), lambda i, j: (i, j)),
        compiler_params=pltpu.CompilerParams(
            dimension_semantics=("parallel", "parallel"),
            vmem_limit_bytes=_vmem_limit_bytes()),
    )(x2d, w, b2d)
    if n_pad != N or m_pad != M:
        out = out[:N, :M]
    return out
    # TODO(synk): for very large K add a reduction grid axis with an f32 VMEM
    # accumulator (pl.when init/finalize) instead of loading the full K dim.


# --------------------------------------------------------------- attention ---
def _make_attention_kernel(num_heads, head_dim, sm_scale, have_mask, have_dict,
                           n_dict):
    def kernel(*refs):
        it = iter(refs)
        expw_ref = next(it) if have_dict else None    # SMEM (H, J) = exp(weights)
        q_ref = next(it)                              # (TILE_Q, E)
        k_ref = next(it)                              # (Sk, E)
        v_ref = next(it)                              # (Sk, E)
        mask_ref = next(it) if have_mask else None    # (TILE_Q, Sk) int32
        dm_ref = next(it) if have_dict else None      # (J, TILE_Q, Sk)
        o_ref = next(it)                              # (TILE_Q, E)

        # Fold 1/sqrt(Dh) into Q once (cheaper than scaling each score block).
        q = q_ref[...] * sm_scale
        if have_mask:
            kill = mask_ref[...] == 0                 # shared across all heads
        if have_dict:
            dm = dm_ref[...].astype(jnp.float32)      # (J, TILE_Q, Sk)

        outs = []
        for h in range(num_heads):
            lo, hi = h * head_dim, (h + 1) * head_dim
            # scores_h = (q_h / sqrt(Dh)) @ k_h^T  (MXU, f32 accumulate)
            s = lax.dot_general(q[:, lo:hi], k_ref[:, lo:hi],
                                (((1,), (1,)), ((), ())),
                                preferred_element_type=jnp.float32)
            if have_mask:
                s = jnp.where(kill, -jnp.inf, s)
            if have_dict:
                d = expw_ref[h, 0] * dm[0]
                for j in range(1, n_dict):
                    d = d + expw_ref[h, j] * dm[j]
                s = s - jnp.nan_to_num(d)
            # numerically stable softmax over the key axis
            m = jnp.max(s, axis=-1, keepdims=True)
            m = jnp.where(m == -jnp.inf, 0.0, m)       # fully-masked-row guard
            p = jnp.exp(s - m)
            denom = jnp.sum(p, axis=-1, keepdims=True)
            inv = jnp.where(denom > 0.0,
                            pl.reciprocal(denom, approx=True), 0.0)
            ctx = jnp.dot(p.astype(v_ref.dtype), v_ref[:, lo:hi],
                          preferred_element_type=jnp.float32) * inv
            outs.append(ctx)
        # single lane-dense (TILE_Q, E) store (heads already merged)
        o_ref[...] = jnp.concatenate(outs, axis=-1).astype(o_ref.dtype)

    return kernel


def attention(q, k, v, mask, dict_mask, exp_weights, *, num_heads,
              max_q_tile=256):
    """q,k,v: (B,S,E) head-interleaved. Returns merged context (B,Sq,E)."""
    B, Sq, E = q.shape
    Sk = k.shape[1]
    head_dim = E // num_heads
    sm_scale = 1.0 / math.sqrt(head_dim)

    have_mask = mask is not None
    have_dict = dict_mask is not None
    n_dict = dict_mask.shape[0] if have_dict else 0

    tq = _round_up(min(Sq, max_q_tile), 8)
    sq_pad = _round_up(Sq, tq)
    if sq_pad != Sq:
        q = jnp.pad(q, ((0, 0), (0, sq_pad - Sq), (0, 0)))

    args, in_specs = [], []
    if have_dict:
        args.append(exp_weights.astype(jnp.float32))        # tiny (H, J) scalars
        in_specs.append(pl.BlockSpec(memory_space=pltpu.MemorySpace.SMEM))
    args += [q, k, v]
    in_specs += [
        pl.BlockSpec((None, tq, E), lambda b, qi: (b, qi, 0)),
        pl.BlockSpec((None, Sk, E), lambda b, qi: (b, 0, 0)),   # resident over qi
        pl.BlockSpec((None, Sk, E), lambda b, qi: (b, 0, 0)),
    ]
    if have_mask:
        m_i = (mask != 0).astype(jnp.int32)                  # (B, Sq, Sk), no H dup
        if sq_pad != Sq:
            m_i = jnp.pad(m_i, ((0, 0), (0, sq_pad - Sq), (0, 0)),
                          constant_values=1)
        args.append(m_i)
        in_specs.append(pl.BlockSpec((None, tq, Sk), lambda b, qi: (b, qi, 0)))
    if have_dict:
        dm = jnp.asarray(dict_mask)                          # (J, B, Sq, Sk)
        if sq_pad != Sq:
            dm = jnp.pad(dm, ((0, 0), (0, 0), (0, sq_pad - Sq), (0, 0)))
        args.append(dm)
        in_specs.append(
            pl.BlockSpec((n_dict, None, tq, Sk), lambda b, qi: (0, b, qi, 0)))

    kernel = _make_attention_kernel(num_heads, head_dim, sm_scale,
                                    have_mask, have_dict, n_dict)
    out = pl.pallas_call(
        kernel,
        out_shape=jax.ShapeDtypeStruct((B, sq_pad, E), q.dtype),
        grid=(B, sq_pad // tq),
        in_specs=in_specs,
        out_specs=pl.BlockSpec((None, tq, E), lambda b, qi: (b, qi, 0)),
        compiler_params=pltpu.CompilerParams(
            dimension_semantics=("parallel", "parallel"),
            vmem_limit_bytes=_vmem_limit_bytes()),
    )(*args)
    if sq_pad != Sq:
        out = out[:, :Sq]
    return out
    # TODO(synk): for very long Sk add a flash-style key-axis grid dimension
    # with an online-softmax accumulator instead of keeping all Sk resident.


# -------------------------------------------------------------- MHA forward --
def multi_head_attention(params, query, key, value, mask=None, dict_mask=None,
                         *, num_heads):
    """Forward matching translation/layers.py MultiHeadAttention (eval mode)."""
    B, Sq, E = query.shape
    Sk = key.shape[1]

    if (query is key) and (key is value):
        # self-attention: fused QKV projection (reads activations once)
        w_qkv = jnp.concatenate([params["wq"], params["wk"], params["wv"]], 0)
        b_qkv = jnp.concatenate([params["bq"], params["bk"], params["bv"]], 0)
        qkv = linear(query.reshape(-1, E), w_qkv, b_qkv).reshape(B, Sq, 3 * E)
        q, k, v = qkv[..., :E], qkv[..., E:2 * E], qkv[..., 2 * E:]
    else:
        q = linear(query.reshape(-1, E), params["wq"], params["bq"]).reshape(B, Sq, E)
        k = linear(key.reshape(-1, E), params["wk"], params["bk"]).reshape(B, Sk, E)
        v = linear(value.reshape(-1, E), params["wv"], params["bv"]).reshape(B, Sk, E)

    exp_w = jnp.exp(params["head_weights"]) if dict_mask is not None else None

    # Heads are split/merged inside the kernel via lane offsets; no (B,S,H,Dh)
    # transposes and no (B,H,Sq,Sk) bias tensor ever touches HBM.
    ctx = attention(q, k, v, mask, dict_mask, exp_w, num_heads=num_heads)

    out = linear(ctx.reshape(-1, E), params["wo"], params["bo"])
    return out.reshape(B, Sq, E)
    # TODO(synk): dropout is eval-mode identity; store_attn caching of the
    # softmax scores is not implemented.


# -------------------------------------------------------------- JAX reference
def mha_ref(params, query, key, value, mask=None, dict_mask=None, *, num_heads):
    B, Sq, E = query.shape
    Sk = key.shape[1]
    H = num_heads
    Dh = E // H
    hp = jax.lax.Precision.HIGHEST

    def lin(x, w, b):
        return jnp.einsum("...i,oi->...o", x, w, precision=hp) + b

    q = lin(query, params["wq"], params["bq"]).reshape(B, Sq, H, Dh).transpose(0, 2, 1, 3)
    k = lin(key, params["wk"], params["bk"]).reshape(B, Sk, H, Dh).transpose(0, 2, 1, 3)
    v = lin(value, params["wv"], params["bv"]).reshape(B, Sk, H, Dh).transpose(0, 2, 1, 3)

    scores = jnp.einsum("bhqd,bhkd->bhqk", q, k, precision=hp) / math.sqrt(Dh)
    if mask is not None:
        scores = jnp.where(mask[:, None, :, :] == 0, -jnp.inf, scores)
    if dict_mask is not None:
        dm = jnp.einsum("ij,j...->i...", jnp.exp(params["head_weights"]), dict_mask)
        scores = scores - jnp.nan_to_num(jnp.transpose(dm, (1, 0, 2, 3)))
    probs = jax.nn.softmax(scores, axis=-1)
    ctx = jnp.einsum("bhqk,bhkd->bhqd", probs, v, precision=hp)
    ctx = ctx.transpose(0, 2, 1, 3).reshape(B, Sq, E)
    return lin(ctx, params["wo"], params["bo"])


if __name__ == "__main__":
    B, S, E, H = 2, 8, 32, 4
    key0 = jax.random.PRNGKey(0)
    keys = jax.random.split(key0, 14)

    def init_linear(kw, kb):
        w = 0.1 * jax.random.normal(kw, (E, E), jnp.float32)   # PyTorch (out, in)
        b = 0.1 * jax.random.normal(kb, (E,), jnp.float32)
        return w, b

    wq, bq = init_linear(keys[0], keys[1])
    wk, bk = init_linear(keys[2], keys[3])
    wv, bv = init_linear(keys[4], keys[5])
    wo, bo = init_linear(keys[6], keys[7])
    head_w = 0.3 * jax.random.normal(keys[12], (H, 2), jnp.float32)
    params = dict(wq=wq, bq=bq, wk=wk, bk=bk, wv=wv, bv=bv, wo=wo, bo=bo,
                  head_weights=head_w)

    query = jax.random.normal(keys[8], (B, S, E), jnp.float32)
    key_in = jax.random.normal(keys[9], (B, S, E), jnp.float32)
    value = jax.random.normal(keys[10], (B, S, E), jnp.float32)

    # causal mask (B, Sq, Sk) and a small dict_mask (2, B, Sq, Sk)
    mask = jnp.broadcast_to(jnp.tril(jnp.ones((S, S), jnp.int32)), (B, S, S))
    dict_mask = 0.5 * jax.random.normal(keys[11], (2, B, S, S), jnp.float32)

    # 1) cross-attention path with mask + dict_mask
    out1 = multi_head_attention(params, query, key_in, value,
                                mask=mask, dict_mask=dict_mask, num_heads=H)
    out1 = jax.block_until_ready(out1)
    ref1 = mha_ref(params, query, key_in, value,
                   mask=mask, dict_mask=dict_mask, num_heads=H)
    assert out1.shape == (B, S, E) and out1.dtype == query.dtype
    err1 = float(jnp.max(jnp.abs(out1 - ref1)))
    assert jnp.allclose(out1, ref1, atol=2e-3, rtol=2e-3), \
        f"cross-attn mismatch, max abs err {err1}"

    # 2) self-attention path (fused QKV projection), no optional masks
    out2 = multi_head_attention(params, query, query, query, num_heads=H)
    out2 = jax.block_until_ready(out2)
    ref2 = mha_ref(params, query, query, query, num_heads=H)
    err2 = float(jnp.max(jnp.abs(out2 - ref2)))
    assert jnp.allclose(out2, ref2, atol=2e-3, rtol=2e-3), \
        f"self-attn mismatch, max abs err {err2}"

    print("KERNEL_OK")
</pallas_src>

<mosaic_0001>
module attributes {stable_mosaic.version = 11 : i64} {
  func.func @_linear_kernel(%arg0: i32, %arg1: i32, %arg2: memref<16x32xf32, #tpu.memory_space<vmem>>, %arg3: memref<32x32xf32, #tpu.memory_space<vmem>>, %arg4: memref<1x32xf32, #tpu.memory_space<vmem>>, %arg5: memref<16x32xf32, #tpu.memory_space<vmem>>) attributes {dimension_semantics = [#tpu.dimension_semantics<parallel>, #tpu.dimension_semantics<parallel>], iteration_bounds = array<i64: 1, 1>, scalar_prefetch = 0 : i64, scratch_operands = 0 : i64, tpu.core_type = #tpu.core_type<tc>, window_params = [{transform_indices = @transform_0, window_bounds = array<i64: 16, 32>}, {transform_indices = @transform_1, window_bounds = array<i64: 32, 32>}, {transform_indices = @transform_2, window_bounds = array<i64: 1, 32>}, {transform_indices = @transform_3, window_bounds = array<i64: 16, 32>}]} {
    %c0 = arith.constant 0 : index
    %c0_0 = arith.constant 0 : index
    %0 = vector.load %arg2[%c0, %c0_0] : memref<16x32xf32, #tpu.memory_space<vmem>>, vector<16x32xf32>
    %c0_1 = arith.constant 0 : index
    %c0_2 = arith.constant 0 : index
    %1 = vector.load %arg3[%c0_1, %c0_2] : memref<32x32xf32, #tpu.memory_space<vmem>>, vector<32x32xf32>
    %cst = arith.constant dense<0.000000e+00> : vector<16x32xf32>
    %2 = tpu.matmul %0, %1, %cst {dimension_numbers = #tpu.dot_dimension_numbers<[1], [1], [0], [0], [0, 0, 1, 0], [], []>} : vector<16x32xf32>, vector<32x32xf32>, vector<16x32xf32> -> vector<16x32xf32>
    %c0_3 = arith.constant 0 : index
    %c0_4 = arith.constant 0 : index
    %3 = vector.load %arg4[%c0_3, %c0_4] : memref<1x32xf32, #tpu.memory_space<vmem>>, vector<1x32xf32>
    %4 = vector.broadcast %3 : vector<1x32xf32> to vector<16x32xf32>
    %5 = arith.addf %2, %4 : vector<16x32xf32>
    %c0_5 = arith.constant 0 : index
    %c0_6 = arith.constant 0 : index
    %6 = vector.load %arg5[%c0_5, %c0_6] : memref<16x32xf32, #tpu.memory_space<vmem>>, vector<16x32xf32>
    tpu.vector_store %arg5[%c0_5, %c0_6], %5 {strides = array<i32>} : memref<16x32xf32, #tpu.memory_space<vmem>>, vector<16x32xf32>,
    return
  }
  func.func @transform_0(%arg0: i32, %arg1: i32) -> (i32, i32) {
    %c0_i32 = arith.constant 0 : i32
    %c0_i32_0 = arith.constant 0 : i32
    return %arg0, %c0_i32 : i32, i32
  }
  func.func @transform_1(%arg0: i32, %arg1: i32) -> (i32, i32) {
    %c0_i32 = arith.constant 0 : i32
    %c0_i32_0 = arith.constant 0 : i32
    return %arg1, %c0_i32 : i32, i32
  }
  func.func @transform_2(%arg0: i32, %arg1: i32) -> (i32, i32) {
    %c0_i32 = arith.constant 0 : i32
    %c0_i32_0 = arith.constant 0 : i32
    return %c0_i32, %arg1 : i32, i32
  }
  func.func @transform_3(%arg0: i32, %arg1: i32) -> (i32, i32) {
    %c0_i32 = arith.constant 0 : i32
    return %arg0, %arg1 : i32, i32
  }
}

</mosaic_0001>

<bundles_post_ra>
// kernel: tpu_custom_call.1
= control target key start
LH: loop header
LB: loop body
LE: loop exit
PB: predicated region body
PF: predicated region fallthrough
CT: control target
= control target key end

     0   :  { %8 = vsyncpa [#allocation3], 0  ;;  %s273_s0 = inlined_call_operand.hbm [shape: f32[16,32], index: 0, kind: input, shape index: {}]   ;;  %s274_s1 = inlined_call_operand.hbm [shape: f32[32,32], index: 1, kind: input, shape index: {}]   ;;  %s275_s2 = inlined_call_operand.vmem [shape: f32[1,32], index: 2, kind: input, shape index: {}]   ;;  %s276_s3 = inlined_call_operand.hbm [shape: f32[16,32], index: 3, kind: output, shape index: {}]  }
   0x1   :  { %9 = vsyncpa [#allocation6], 0 }
   0x2   :  { %10 = vsyncpa [#allocation4], 0  ;;  %s15_s14 = sshll.u32 %s273_s0, 4  ;;  %s215_s15 = smov [#allocation2]   ;;  %s16_s14 = int_to_ptr.hbm [resolvable:$true] %s15_s14 }
   0x3   :  { %s17_s16 = sshll.u32 %s215_s15, 4  ;;  %s28_s19 = sshll.u32 %s274_s1, 4  ;;  %s18_s16 = int_to_ptr.vmem [resolvable:$true] %s17_s16  ;;  %s29_s19 = int_to_ptr.hbm [resolvable:$true] %s28_s19 }
   0x4   :  { %s216_s20 = smov 128   ;;  %s217_s21 = smov 8  }
   0x5   :  { %23 = dma.hbm_to_vmem [thread:$0]  %s16_s14, 256, %s18_s16, [#allocation3], %s216_s20, %s216_s20, %s217_s21  }
   0x6   :  { %s218_s22 = smov [#allocation5]  }
   0x7   :  { %s30_s23 = sshll.u32 %s218_s22, 4  ;;  %s31_s23 = int_to_ptr.vmem [resolvable:$true] %s30_s23 }
   0x8   :  { %36 = dma.hbm_to_vmem [thread:$0]  %s29_s19, 512, %s31_s23, [#allocation6], %s216_s20, %s216_s20, %s217_s21  }
   0x9   :  { %209 = dma.done.wait [#allocation3], 256  }
   0xa   :  { %210 = vsyncadd [#allocation3], 4294967040 }
   0xb   :  { %211 = dma.done.wait [#allocation6], 512  }
   0xc   :  { %212 = vsyncadd [#allocation6], 4294966784  ;;  %vm57_vm0 = vcmask 261120   ;;  %v52_v0 = vld [vmem:[#allocation5 + $0x18] sm:$0xff]  ;;  %v51_v1 = vld [vmem:[#allocation5 + $0x10] sm:$0xff]  ;;  %s219_s24 = smov [#allocation7]  }
   0xd   :  { %121 = vmatpush.xpose.msk.msra.mxu0 %vm57_vm0, %v52_v0  ;;  %127 = vmatpush.xpose.msk.msra.mxu1 %vm57_vm0, %v52_v0  ;;  %v50_v2 = vld [vmem:[#allocation5 + $0x8] sm:$0xff]  ;;  %v49_v3 = vld [vmem:[#allocation5] sm:$0xff]  ;;  %v47_v4 = vld [vmem:[#allocation2] sm:$0xff]  ;;  %s105_s25 = sshll.u32 %s219_s24, 4  ;;  %s107_s28 = sshll.u32 %s276_s3, 4  ;;  %s106_s25 = int_to_ptr.vmem [resolvable:$true] %s105_s25  ;;  %s108_s28 = int_to_ptr.hbm [resolvable:$true] %s107_s28 }
   0xe   :  { %v48_v5 = vld [vmem:[#allocation2 + $0x8] sm:$0xff]  ;;  %v136_v6 = vld [vmem:[%s275_s2] ss:$0 sm:$0xff] }
  0x11   :  { %122 = vmatpush.xpose.msk.msra.mxu0 %vm57_vm0, %v51_v1  ;;  %128 = vmatpush.xpose.msk.msra.mxu1 %vm57_vm0, %v51_v1 }
  0x15   :  { %123 = vmatpush.xpose.msk.msra.mxu0 %vm57_vm0, %v50_v2  ;;  %129 = vmatpush.xpose.msk.msra.mxu1 %vm57_vm0, %v50_v2 }
  0x19   :  { %124 = vmatpush.xpose.msk.msra.mxu0 %vm57_vm0, %v49_v3  ;;  %130 = vmatpush.xpose.msk.msra.mxu1 %vm57_vm0, %v49_v3 }
  0x1c   :  { %125 = vmatmul.msk.f32.vlgmr.msra.gmra.mxu0 %vm57_vm0, %v47_v4  ;;  %126 = vmatmul.msk.f32.vlgmr.msra.gmra.mxu1 %vm57_vm0, %v48_v5 }
  0x99   :  { %v93_v7 = vpop.f32.mrf.mxu0  ;;  %v96_v8 = vpop.f32.mrf.mxu1 }
  0x9a   :  { %v94_v9 = vadd.f32 %v136_v6, %v93_v7  ;;  %v97_v10 = vadd.f32 %v136_v6, %v96_v8 }
  0x9c   :  { %99 = vst.msk [vmem:[#allocation7] sm:$0xff] %vm57_vm0, %v94_v9 }
  0x9d   :  { %100 = vst.msk [vmem:[#allocation7 + $0x8] sm:$0xff] %vm57_vm0, %v97_v10 }
  0x9e   :  { %113 = dma.vmem_to_hbm [thread:$0]  %s106_s25, 256, %s108_s28, [#allocation4], %s216_s20, %s216_s20, %s217_s21  }
  0x9f   :  { %213 = dma.done.wait [#allocation4], 256  }
  0xa0   :  { %214 = vsyncadd [#allocation4], 4294967040 }
  0xa1   :  { %118 = vsyncpa [#allocation3], 1 }
  0xa2   :  { %119 = vsyncpa [#allocation6], 1 }
  0xa3   :  { %120 = vsyncpa [#allocation4], 1 }

</bundles_post_ra>
